<compile_context>
chip_gen: v6e
topology: v6e:2x2x1
jax: 0.10.0
libtpu: 0.0.40
codegen_flags: <defaults>
</compile_context>

<pallas_src>
import jax
import jax.numpy as jnp
from jax.experimental import pallas as pl
from jax.experimental.pallas import tpu as pltpu

HIDDEN = 256
MAX_BATCH_TILE = 1024  # large tiles amortize per-grid-step overhead; WS stays ~3 MiB


def _round_up(x, m):
    return ((x + m - 1) // m) * m


def policy_mlp_kernel(x_ref, w1_ref, b1_ref, w2_ref, b2_ref, w3t_ref, b3_ref, o_ref):
    """Fused policy MLP on one batch tile.

    Layer 1: VPU broadcast FMAs (dim_obs tiny) in f32.
    Layer 2: MXU matmul (f32 accumulation), bias/ReLU epilogue in compute dtype.
    Layer 3: VPU multiply + lane reduction (dim_actions tiny), f32 output.
    """
    cdt = w2_ref.dtype                      # MXU / epilogue compute dtype
    dim_obs = w1_ref.shape[0]
    d_act = w3t_ref.shape[0]

    # ---- layer 1 ----
    if dim_obs <= 16:
        xf = x_ref[...].astype(jnp.float32)                       # (tb, dim_obs)
        w1f = w1_ref[...].astype(jnp.float32)                     # (dim_obs, H)
        h = b1_ref[...]                                           # (1, H) f32, broadcasts
        for k in range(dim_obs):                                  # unrolled at trace time
            h = h + xf[:, k:k + 1] * w1f[k:k + 1, :]
    else:
        h = jnp.dot(x_ref[...].astype(cdt), w1_ref[...],
                    preferred_element_type=jnp.float32) + b1_ref[...]
    h1 = jnp.maximum(h, 0.0).astype(cdt)                          # (tb, H)

    # ---- layer 2 (dominant MXU matmul) ----
    h2 = jnp.dot(h1, w2_ref[...], preferred_element_type=jnp.float32)
    h2 = jnp.maximum(h2.astype(cdt) + b2_ref[...], 0.0)           # compute-dtype epilogue

    # ---- layer 3 ----
    if d_act == 1:
        h2f = h2.astype(jnp.float32)
        o = jnp.sum(h2f * w3t_ref[...].astype(jnp.float32), axis=-1, keepdims=True)
    elif d_act <= 8:
        h2f = h2.astype(jnp.float32)
        w3f = w3t_ref[...].astype(jnp.float32)                    # (d_act, H)
        cols = [jnp.sum(h2f * w3f[a:a + 1, :], axis=-1, keepdims=True)
                for a in range(d_act)]
        o = jnp.concatenate(cols, axis=-1)
    else:
        o = jax.lax.dot_general(h2, w3t_ref[...],
                                dimension_numbers=(((1,), (1,)), ((), ())),
                                preferred_element_type=jnp.float32)
    o_ref[...] = o + b3_ref[...]                                  # f32 bias, f32 output


def prepare_params(params, compute_dtype=jnp.bfloat16):
    """One-time (out-of-hot-path) layout/cast of the policy weights.

    No feature-dim padding.  w3 is stored transposed as (dim_actions, hidden) so
    the kernel's lane-reduction layer 3 needs no in-kernel transpose.  b1/b3 stay
    f32 (they feed f32 adds); b2 is stored in the compute dtype for the bf16
    epilogue on v6e/v7x.
    """
    hidden = params["w2"].shape[0]
    return {
        "w1": params["w1"].astype(compute_dtype),                      # (dim_obs, H)
        "b1": params["b1"].reshape(1, hidden).astype(jnp.float32),     # (1, H)
        "w2": params["w2"].astype(compute_dtype),                      # (H, H)
        "b2": params["b2"].reshape(1, hidden).astype(compute_dtype),   # (1, H)
        "w3t": params["w3"].T.astype(compute_dtype),                   # (d_act, H)
        "b3": params["b3"].reshape(1, -1).astype(jnp.float32),         # (1, d_act)
    }


@jax.jit
def cql_forward(states, prepared):
    """CQL.forward(states, eval_flag=True) -> deterministic policy mean."""
    w1, b1 = prepared["w1"], prepared["b1"]
    w2, b2 = prepared["w2"], prepared["b2"]
    w3t, b3 = prepared["w3t"], prepared["b3"]
    B, dim_obs = states.shape
    hidden = w2.shape[0]
    dim_actions = w3t.shape[0]
    compute_dtype = jnp.dtype(w2.dtype)

    # Batch tiling: big tiles (amortize step overhead), but keep >=2 tiles for
    # mid-size batches so v7x can shard the "parallel" axis across its 2 TCs.
    # Rows align to 16 for bf16 (2 rows/sublane) and 8 for f32.
    row_align = max(8, 32 // compute_dtype.itemsize)
    tb = max(row_align, min(MAX_BATCH_TILE, _round_up(pl.cdiv(B, 2), row_align)))
    grid = (pl.cdiv(B, tb),)   # ragged tail tile: OOB rows masked on writeback

    return pl.pallas_call(
        policy_mlp_kernel,
        out_shape=jax.ShapeDtypeStruct((B, dim_actions), jnp.float32),
        grid=grid,
        in_specs=[
            pl.BlockSpec((tb, dim_obs), lambda i: (i, 0)),       # streamed x tile (unpadded)
            pl.BlockSpec((dim_obs, hidden), lambda i: (0, 0)),   # resident weights/biases
            pl.BlockSpec((1, hidden), lambda i: (0, 0)),
            pl.BlockSpec((hidden, hidden), lambda i: (0, 0)),
            pl.BlockSpec((1, hidden), lambda i: (0, 0)),
            pl.BlockSpec((dim_actions, hidden), lambda i: (0, 0)),
            pl.BlockSpec((1, dim_actions), lambda i: (0, 0)),
        ],
        out_specs=pl.BlockSpec((tb, dim_actions), lambda i: (i, 0)),
        compiler_params=pltpu.CompilerParams(
            dimension_semantics=("parallel",),   # shard batch tiles across TCs on v7x
        ),
    )(states, w1, b1, w2, b2, w3t, b3)


def init_params(key, dim_obs, dim_actions):
    """Deterministic PyTorch-style (uniform +/- 1/sqrt(fan_in)) init, weights as (in, out)."""
    def linear(key, fan_in, fan_out):
        kw, kb = jax.random.split(key)
        bound = 1.0 / jnp.sqrt(jnp.float32(fan_in))
        w = jax.random.uniform(kw, (fan_in, fan_out), jnp.float32, -bound, bound)
        b = jax.random.uniform(kb, (fan_out,), jnp.float32, -bound, bound)
        return w, b

    k1, k2, k3 = jax.random.split(key, 3)
    w1, b1 = linear(k1, dim_obs, HIDDEN)
    w2, b2 = linear(k2, HIDDEN, HIDDEN)
    w3, b3 = linear(k3, HIDDEN, dim_actions)
    return {"w1": w1, "b1": b1, "w2": w2, "b2": b2, "w3": w3, "b3": b3}


def reference_forward(states, params):
    h1 = jnp.maximum(states @ params["w1"] + params["b1"], 0.0)
    h2 = jnp.maximum(h1 @ params["w2"] + params["b2"], 0.0)
    return h2 @ params["w3"] + params["b3"]


if __name__ == "__main__":
    # TODO(synk): only the deterministic forward (eval_flag=True) is implemented;
    # the reparameterized sampling path and CQL.step training loop are out of scope.
    dim_obs, dim_actions = 2, 1
    key = jax.random.PRNGKey(0)
    k_params, k_s1, k_s2 = jax.random.split(key, 3)

    params = init_params(k_params, dim_obs, dim_actions)

    # 1) f32 compute path, small batch: exact vs pure-JAX reference.
    prepared_f32 = prepare_params(params, compute_dtype=jnp.float32)
    states_small = jax.random.normal(k_s1, (8, dim_obs), jnp.float32)
    act_f32 = jax.block_until_ready(cql_forward(states_small, prepared_f32))
    ref_small = reference_forward(states_small, params)
    assert act_f32.shape == (8, dim_actions)
    assert jnp.allclose(act_f32, ref_small, atol=1e-5, rtol=1e-5)

    # 2) Default bf16-weight path, larger batch: exercises a 2-tile grid with a
    #    ragged (masked) tail tile.
    prepared_bf16 = prepare_params(params)
    states_big = jax.random.normal(k_s2, (300, dim_obs), jnp.float32)
    act_bf16 = jax.block_until_ready(cql_forward(states_big, prepared_bf16))
    ref_big = reference_forward(states_big, params)
    assert act_bf16.shape == (300, dim_actions)
    assert jnp.allclose(act_bf16, ref_big, atol=3e-2, rtol=3e-2)

    print("KERNEL_OK")
</pallas_src>

<mosaic_0001>
module attributes {stable_mosaic.version = 11 : i64} {
  func.func @policy_mlp_kernel(%arg0: i32, %arg1: memref<8x2xf32, #tpu.memory_space<vmem>>, %arg2: memref<2x256xf32, #tpu.memory_space<vmem>>, %arg3: memref<1x256xf32, #tpu.memory_space<vmem>>, %arg4: memref<256x256xf32, #tpu.memory_space<vmem>>, %arg5: memref<1x256xf32, #tpu.memory_space<vmem>>, %arg6: memref<1x256xf32, #tpu.memory_space<vmem>>, %arg7: memref<1x1xf32, #tpu.memory_space<vmem>>, %arg8: memref<8x1xf32, #tpu.memory_space<vmem>>) attributes {dimension_semantics = [#tpu.dimension_semantics<parallel>], iteration_bounds = array<i64: 1>, scalar_prefetch = 0 : i64, scratch_operands = 0 : i64, tpu.core_type = #tpu.core_type<tc>, window_params = [{transform_indices = @transform_0, window_bounds = array<i64: 8, 2>}, {pipeline_mode = #tpu.pipeline_mode<synchronous>, transform_indices = @transform_1, window_bounds = array<i64: 2, 256>}, {pipeline_mode = #tpu.pipeline_mode<synchronous>, transform_indices = @transform_2, window_bounds = array<i64: 1, 256>}, {pipeline_mode = #tpu.pipeline_mode<synchronous>, transform_indices = @transform_3, window_bounds = array<i64: 256, 256>}, {pipeline_mode = #tpu.pipeline_mode<synchronous>, transform_indices = @transform_4, window_bounds = array<i64: 1, 256>}, {pipeline_mode = #tpu.pipeline_mode<synchronous>, transform_indices = @transform_5, window_bounds = array<i64: 1, 256>}, {pipeline_mode = #tpu.pipeline_mode<synchronous>, transform_indices = @transform_6, window_bounds = array<i64: 1, 1>}, {transform_indices = @transform_7, window_bounds = array<i64: 8, 1>}]} {
    %c0 = arith.constant 0 : index
    %c0_0 = arith.constant 0 : index
    %0 = vector.load %arg1[%c0, %c0_0] : memref<8x2xf32, #tpu.memory_space<vmem>>, vector<8x2xf32>
    %c0_1 = arith.constant 0 : index
    %c0_2 = arith.constant 0 : index
    %1 = vector.load %arg2[%c0_1, %c0_2] : memref<2x256xf32, #tpu.memory_space<vmem>>, vector<2x256xf32>
    %c0_3 = arith.constant 0 : index
    %c0_4 = arith.constant 0 : index
    %2 = vector.load %arg3[%c0_3, %c0_4] : memref<1x256xf32, #tpu.memory_space<vmem>>, vector<1x256xf32>
    %3 = vector.extract_strided_slice %0 {offsets = [0, 0], sizes = [8, 1], strides = [1, 1]} : vector<8x2xf32> to vector<8x1xf32>
    %4 = vector.extract_strided_slice %1 {offsets = [0, 0], sizes = [1, 256], strides = [1, 1]} : vector<2x256xf32> to vector<1x256xf32>
    %5 = vector.broadcast %3 : vector<8x1xf32> to vector<8x256xf32>
    %6 = vector.broadcast %4 : vector<1x256xf32> to vector<8x256xf32>
    %7 = arith.mulf %5, %6 : vector<8x256xf32>
    %8 = vector.broadcast %2 : vector<1x256xf32> to vector<8x256xf32>
    %9 = arith.addf %8, %7 : vector<8x256xf32>
    %10 = vector.extract_strided_slice %0 {offsets = [0, 1], sizes = [8, 1], strides = [1, 1]} : vector<8x2xf32> to vector<8x1xf32>
    %11 = vector.extract_strided_slice %1 {offsets = [1, 0], sizes = [1, 256], strides = [1, 1]} : vector<2x256xf32> to vector<1x256xf32>
    %12 = vector.broadcast %10 : vector<8x1xf32> to vector<8x256xf32>
    %13 = vector.broadcast %11 : vector<1x256xf32> to vector<8x256xf32>
    %14 = arith.mulf %12, %13 : vector<8x256xf32>
    %15 = arith.addf %9, %14 : vector<8x256xf32>
    %cst = arith.constant 0.000000e+00 : f32
    %16 = vector.broadcast %cst : f32 to vector<8x256xf32>
    %17 = arith.maximumf %15, %16 : vector<8x256xf32>
    %c0_5 = arith.constant 0 : index
    %c0_6 = arith.constant 0 : index
    %18 = vector.load %arg4[%c0_5, %c0_6] : memref<256x256xf32, #tpu.memory_space<vmem>>, vector<256x256xf32>
    %cst_7 = arith.constant dense<0.000000e+00> : vector<8x256xf32>
    %19 = tpu.matmul %17, %18, %cst_7 {dimension_numbers = #tpu.dot_dimension_numbers<[1], [0], [0], [1], [0, 0, 1, 1], [], []>} : vector<8x256xf32>, vector<256x256xf32>, vector<8x256xf32> -> vector<8x256xf32>
    %c0_8 = arith.constant 0 : index
    %c0_9 = arith.constant 0 : index
    %20 = vector.load %arg5[%c0_8, %c0_9] : memref<1x256xf32, #tpu.memory_space<vmem>>, vector<1x256xf32>
    %21 = vector.broadcast %20 : vector<1x256xf32> to vector<8x256xf32>
    %22 = arith.addf %19, %21 : vector<8x256xf32>
    %cst_10 = arith.constant 0.000000e+00 : f32
    %23 = vector.broadcast %cst_10 : f32 to vector<8x256xf32>
    %24 = arith.maximumf %22, %23 : vector<8x256xf32>
    %c0_11 = arith.constant 0 : index
    %c0_12 = arith.constant 0 : index
    %25 = vector.load %arg6[%c0_11, %c0_12] : memref<1x256xf32, #tpu.memory_space<vmem>>, vector<1x256xf32>
    %26 = vector.broadcast %25 : vector<1x256xf32> to vector<8x256xf32>
    %27 = arith.mulf %24, %26 : vector<8x256xf32>
    %cst_13 = arith.constant dense<0.000000e+00> : vector<8xf32>
    %28 = vector.multi_reduction <add>, %27, %cst_13 [1] : vector<8x256xf32> to vector<8xf32>
    %29 = vector.shape_cast %28 : vector<8xf32> to vector<8x1xf32>
    %c0_14 = arith.constant 0 : index
    %c0_15 = arith.constant 0 : index
    %30 = vector.load %arg7[%c0_14, %c0_15] : memref<1x1xf32, #tpu.memory_space<vmem>>, vector<1x1xf32>
    %31 = vector.broadcast %30 : vector<1x1xf32> to vector<8x1xf32>
    %32 = arith.addf %29, %31 : vector<8x1xf32>
    %c0_16 = arith.constant 0 : index
    %c0_17 = arith.constant 0 : index
    %33 = vector.load %arg8[%c0_16, %c0_17] : memref<8x1xf32, #tpu.memory_space<vmem>>, vector<8x1xf32>
    tpu.vector_store %arg8[%c0_16, %c0_17], %32 {strides = array<i32>} : memref<8x1xf32, #tpu.memory_space<vmem>>, vector<8x1xf32>,
    return
  }
  func.func @transform_0(%arg0: i32) -> (i32, i32) {
    %c0_i32 = arith.constant 0 : i32
    %c0_i32_0 = arith.constant 0 : i32
    return %arg0, %c0_i32 : i32, i32
  }
  func.func @transform_1(%arg0: i32) -> (i32, i32) {
    %c0_i32 = arith.constant 0 : i32
    %c0_i32_0 = arith.constant 0 : i32
    %c0_i32_1 = arith.constant 0 : i32
    return %c0_i32, %c0_i32_0 : i32, i32
  }
  func.func @transform_2(%arg0: i32) -> (i32, i32) {
    %c0_i32 = arith.constant 0 : i32
    %c0_i32_0 = arith.constant 0 : i32
    %c0_i32_1 = arith.constant 0 : i32
    return %c0_i32, %c0_i32_0 : i32, i32
  }
  func.func @transform_3(%arg0: i32) -> (i32, i32) {
    %c0_i32 = arith.constant 0 : i32
    %c0_i32_0 = arith.constant 0 : i32
    %c0_i32_1 = arith.constant 0 : i32
    return %c0_i32, %c0_i32_0 : i32, i32
  }
  func.func @transform_4(%arg0: i32) -> (i32, i32) {
    %c0_i32 = arith.constant 0 : i32
    %c0_i32_0 = arith.constant 0 : i32
    %c0_i32_1 = arith.constant 0 : i32
    return %c0_i32, %c0_i32_0 : i32, i32
  }
  func.func @transform_5(%arg0: i32) -> (i32, i32) {
    %c0_i32 = arith.constant 0 : i32
    %c0_i32_0 = arith.constant 0 : i32
    %c0_i32_1 = arith.constant 0 : i32
    return %c0_i32, %c0_i32_0 : i32, i32
  }
  func.func @transform_6(%arg0: i32) -> (i32, i32) {
    %c0_i32 = arith.constant 0 : i32
    %c0_i32_0 = arith.constant 0 : i32
    %c0_i32_1 = arith.constant 0 : i32
    return %c0_i32, %c0_i32_0 : i32, i32
  }
  func.func @transform_7(%arg0: i32) -> (i32, i32) {
    %c0_i32 = arith.constant 0 : i32
    %c0_i32_0 = arith.constant 0 : i32
    return %arg0, %c0_i32 : i32, i32
  }
}

</mosaic_0001>

<bundles_post_ra>
// kernel: cql_forward.1
= control target key start
LH: loop header
LB: loop body
LE: loop exit
PB: predicated region body
PF: predicated region fallthrough
CT: control target
= control target key end

     0   :  { %s392_s0 = inlined_call_operand.vmem [shape: f32[8,2], index: 0, kind: input, shape index: {}]   ;;  %s393_s1 = inlined_call_operand.vmem [shape: f32[2,256], index: 1, kind: input, shape index: {}]   ;;  %s394_s2 = inlined_call_operand.vmem [shape: f32[1,256], index: 2, kind: input, shape index: {}]   ;;  %s395_s3 = inlined_call_operand.hbm [shape: f32[256,256], index: 3, kind: input, shape index: {}]   ;;  %s396_s4 = inlined_call_operand.vmem [shape: f32[1,256], index: 4, kind: input, shape index: {}]   ;;  %s397_s5 = inlined_call_operand.vmem [shape: f32[1,256], index: 5, kind: input, shape index: {}]   ;;  %s398_s6 = inlined_call_operand.<no memory space> [shape: f32[1,1], index: 6, kind: input, shape index: {}]   ;;  %s399_s7 = inlined_call_operand.vmem [shape: f32[8,1], index: 7, kind: output, shape index: {}]  }
   0x1   :  { %v12_v0 = vstv %s398_s6 }
   0x2   :  { %13 = vst [vmem:[#allocation2] sm:$0x1] %v12_v0 }
   0x3   :  { %14 = vsyncpa [#allocation4], 0  ;;  %s323_s26 = smov [#allocation3]  }
   0x4   :  { %s26_s27 = sshll.u32 %s323_s26, 4  ;;  %s27_s27 = int_to_ptr.vmem [resolvable:$true] %s26_s27 }
   0x5   :  { %s309_s28 = scalar_lea.vmem %s27_s27, 8192  ;;  %p314_p1 = scmp.lt.s32.totalorder %s27_s27, %s27_s27 }
   0x6   :  { %p310_p0 = scmp.ne.s32.totalorder %s27_s27, %s309_s28  ;;  %p315_p2 = scmp.lt.s32.totalorder %s309_s28, %s309_s28 }
   0x8   :  { %p316_p3 = por %p315_p2, %p314_p1 }
   0xa   :  { %p317_p4 = pnand %p316_p3, %p310_p0 }
   0xc   :  { %320 = shalt.err (!%p317_p4)
}
   0xd   :  { %s324_s29 = smov 256   ;;  %s325_s30 = smov 16  }
   0xe   :  { %32 = dma.hbm_to_vmem [thread:$0]  %s395_s3, 8192, %s27_s27, [#allocation4], %s324_s29, %s324_s29, %s325_s30  }
   0xf   :  { %321 = dma.done.wait [#allocation4], 8192  }
  0x10   :  { %322 = vsyncadd [#allocation4], 4294959104  ;;  %v326_v1 = vmov 0   ;;  %v42_v2 = vld [vmem:[%s392_s0] sm:$0xff]  ;;  %v142_v4 = vld [vmem:[#allocation3 + $0xf0] sm:$0xff]  ;;  %v327_v10 = vmov 1  }
  0x11   :  { %299 = vset.pattern.permute.xlu0 %v326_v1  ;;  %v143_v3 = vld [vmem:[#allocation3 + $0xf8] sm:$0xff]  ;;  %v141_v5 = vld [vmem:[#allocation3 + $0xe8] sm:$0xff]  ;;  %v140_v6 = vld [vmem:[#allocation3 + $0xe0] sm:$0xff]  ;;  %vm286_vm0 = vcmask 7168  }
  0x12   :  { %47 = vperm.xlu0 %299, %v42_v2   ;;  %188 = vmatprep.subr.mxu0 %v143_v3  ;;  %v139_v7 = vld [vmem:[#allocation3 + $0xd8] sm:$0xff]  ;;  %v138_v8 = vld [vmem:[#allocation3 + $0xd0] sm:$0xff]  ;;  %v137_v9 = vld [vmem:[#allocation3 + $0xc8] sm:$0xff] }
  0x13   :  { %189 = vmatpush1.msra.mxu0 %v142_v4  ;;  %v136_v11 = vld [vmem:[#allocation3 + $0xc0] sm:$0xff]  ;;  %v135_v12 = vld [vmem:[#allocation3 + $0xb8] sm:$0xff]  ;;  %v134_v13 = vld [vmem:[#allocation3 + $0xb0] sm:$0xff]  ;;  %v51_v4 = vlaneseq }
  0x14   :  { %190 = vmatprep.subr.mxu0 %v141_v5  ;;  %v133_v14 = vld [vmem:[#allocation3 + $0xa8] sm:$0xff]  ;;  %v132_v15 = vld [vmem:[#allocation3 + $0xa0] sm:$0xff]  ;;  %v131_v16 = vld [vmem:[#allocation3 + $0x98] sm:$0xff] }
  0x15   :  { %191 = vmatpush1.msra.mxu0 %v140_v6  ;;  %v130_v17 = vld [vmem:[#allocation3 + $0x90] sm:$0xff]  ;;  %v129_v18 = vld [vmem:[#allocation3 + $0x88] sm:$0xff]  ;;  %v128_v19 = vld [vmem:[#allocation3 + $0x80] sm:$0xff]  ;;  %v52_v5 = vshrl.u32 %v51_v4, 7 }
  0x16   :  { %300 = vset.pattern.permute.xlu0 %v327_v10  ;;  %192 = vmatprep.subr.mxu0 %v139_v7  ;;  %v127_v20 = vld [vmem:[#allocation3 + $0x78] sm:$0xff]  ;;  %v126_v21 = vld [vmem:[#allocation3 + $0x70] sm:$0xff]  ;;  %v125_v22 = vld [vmem:[#allocation3 + $0x68] sm:$0xff] }
  0x17   :  { %85 = vperm.xlu0 %300, %v42_v2   ;;  %193 = vmatpush1.msra.mxu0 %v138_v8  ;;  %v124_v23 = vld [vmem:[#allocation3 + $0x60] sm:$0xff]  ;;  %v123_v24 = vld [vmem:[#allocation3 + $0x58] sm:$0xff]  ;;  %v122_v25 = vld [vmem:[#allocation3 + $0x50] sm:$0xff]  ;;  %v53_v6 = vsub.s32 0, %v52_v5  ;;  %v57_v7 = vsub.s32 2, %v52_v5 }
  0x18   :  { %194 = vmatprep.subr.mxu0 %v137_v9  ;;  %v121_v26 = vld [vmem:[#allocation3 + $0x48] sm:$0xff]  ;;  %v120_v27 = vld [vmem:[#allocation3 + $0x40] sm:$0xff]  ;;  %v119_v28 = vld [vmem:[#allocation3 + $0x38] sm:$0xff] }
  0x19   :  { %195 = vmatpush1.msra.mxu0 %v136_v11  ;;  %v118_v29 = vld [vmem:[#allocation3 + $0x30] sm:$0xff]  ;;  %v117_v30 = vld [vmem:[#allocation3 + $0x28] sm:$0xff]  ;;  %v116_v31 = vld [vmem:[#allocation3 + $0x20] sm:$0xff]  ;;  %v78_v11 = vsub.s32 1, %v52_v5 }
  0x1a   :  { %196 = vmatprep.subr.mxu0 %v135_v12  ;;  %v115_v32 = vld [vmem:[#allocation3 + $0x18] sm:$0xff]  ;;  %v114_v33 = vld [vmem:[#allocation3 + $0x10] sm:$0xff]  ;;  %v113_v34 = vld [vmem:[#allocation3 + $0x8] sm:$0xff]  ;;  %v94_v12 = vsub.s32 3, %v52_v5 }
  0x1b   :  { %197 = vmatpush1.msra.mxu0 %v134_v13  ;;  %v112_v35 = vld [vmem:[#allocation3] sm:$0xff]  ;;  %v175_v36 = vld [vmem:[#allocation3 + $0x1f8] sm:$0xff]  ;;  %v174_v37 = vld [vmem:[#allocation3 + $0x1f0] sm:$0xff] }
  0x1c   :  { %198 = vmatprep.subr.mxu0 %v133_v14  ;;  %v173_v38 = vld [vmem:[#allocation3 + $0x1e8] sm:$0xff]  ;;  %v172_v39 = vld [vmem:[#allocation3 + $0x1e0] sm:$0xff]  ;;  %v171_v40 = vld [vmem:[#allocation3 + $0x1d8] sm:$0xff] }
  0x1d   :  { %199 = vmatpush1.msra.mxu0 %v132_v15  ;;  %v170_v41 = vld [vmem:[#allocation3 + $0x1d0] sm:$0xff]  ;;  %v169_v42 = vld [vmem:[#allocation3 + $0x1c8] sm:$0xff]  ;;  %v168_v43 = vld [vmem:[#allocation3 + $0x1c0] sm:$0xff] }
  0x1e   :  { %200 = vmatprep.subr.mxu0 %v131_v16  ;;  %v167_v44 = vld [vmem:[#allocation3 + $0x1b8] sm:$0xff]  ;;  %v166_v45 = vld [vmem:[#allocation3 + $0x1b0] sm:$0xff]  ;;  %v165_v46 = vld [vmem:[#allocation3 + $0x1a8] sm:$0xff] }
  0x1f   :  { %201 = vmatpush1.msra.mxu0 %v130_v17  ;;  %v164_v47 = vld [vmem:[#allocation3 + $0x1a0] sm:$0xff]  ;;  %v163_v48 = vld [vmem:[#allocation3 + $0x198] sm:$0xff]  ;;  %v162_v49 = vld [vmem:[#allocation3 + $0x190] sm:$0xff] }
  0x20   :  { %202 = vmatprep.subr.mxu0 %v129_v18  ;;  %v161_v50 = vld [vmem:[#allocation3 + $0x188] sm:$0xff]  ;;  %v160_v51 = vld [vmem:[#allocation3 + $0x180] sm:$0xff]  ;;  %v159_v52 = vld [vmem:[#allocation3 + $0x178] sm:$0xff] }
  0x21   :  { %203 = vmatpush1.msra.mxu0 %v128_v19  ;;  %v158_v53 = vld [vmem:[#allocation3 + $0x170] sm:$0xff]  ;;  %v157_v54 = vld [vmem:[#allocation3 + $0x168] sm:$0xff]  ;;  %v156_v55 = vld [vmem:[#allocation3 + $0x160] sm:$0xff] }
  0x22   :  { %204 = vmatprep.subr.mxu0 %v127_v20  ;;  %v155_v56 = vld [vmem:[#allocation3 + $0x158] sm:$0xff]  ;;  %v154_v57 = vld [vmem:[#allocation3 + $0x150] sm:$0xff]  ;;  %v153_v58 = vld [vmem:[#allocation3 + $0x148] sm:$0xff] }
  0x23   :  { %205 = vmatpush1.msra.mxu0 %v126_v21  ;;  %v152_v59 = vld [vmem:[#allocation3 + $0x140] sm:$0xff]  ;;  %v151_v60 = vld [vmem:[#allocation3 + $0x138] sm:$0xff]  ;;  %v150_v61 = vld [vmem:[#allocation3 + $0x130] sm:$0xff] }
  0x24   :  { %206 = vmatprep.subr.mxu0 %v125_v22  ;;  %v149_v62 = vld [vmem:[#allocation3 + $0x128] sm:$0xff]  ;;  %v148_v63 = vld [vmem:[#allocation3 + $0x120] sm:$0xff]  ;;  %v147_v0 = vld [vmem:[#allocation3 + $0x118] sm:$0xff] }
  0x25   :  { %207 = vmatpush1.msra.mxu0 %v124_v23  ;;  %v146_v1 = vld [vmem:[#allocation3 + $0x110] sm:$0xff]  ;;  %v145_v2 = vld [vmem:[#allocation3 + $0x108] sm:$0xff]  ;;  %v144_v3 = vld [vmem:[#allocation3 + $0x100] sm:$0xff] }
  0x26   :  { %208 = vmatprep.subr.mxu0 %v123_v24  ;;  %v43_v8 = vld [vmem:[%s393_s1] sm:$0xf] }
  0x27   :  { %209 = vmatpush1.msra.mxu0 %v122_v25  ;;  %v54_v9 = vrot.slane %v43_v8, %v53_v6  ;;  %v58_v10 = vrot.slane %v43_v8, %v57_v7  ;;  %v44_v13 = vld [vmem:[%s394_s2] sm:$0x3]  ;;  %v91_v16 = vrot.slane %v43_v8, %v78_v11  ;;  %v95_v17 = vrot.slane %v43_v8, %v94_v12 }
  0x28   :  { %210 = vmatprep.subr.mxu0 %v121_v26  ;;  %v75_v19 = vrot.slane %v44_v13, %v53_v6  ;;  %v79_v20 = vrot.slane %v44_v13, %v78_v11 }
  0x29   :  { %211 = vmatpush1.msra.mxu0 %v120_v27  ;;  %v64_v14 = vrot.slane %v54_v9, %v53_v6  ;;  %v68_v15 = vrot.slane %v58_v10, %v53_v6  ;;  %v101_v23 = vrot.slane %v91_v16, %v78_v11  ;;  %v105_v24 = vrot.slane %v95_v17, %v78_v11 }
  0x2a   :  { %212 = vmatprep.subr.mxu0 %v119_v28 }
  0x2b   :  { %213 = vmatpush1.msra.mxu0 %v118_v29 }
  0x2c   :  { %214 = vmatprep.subr.mxu0 %v117_v30 }
  0x2d   :  { %215 = vmatpush1.msra.mxu0 %v116_v31 }
  0x2e   :  { %216 = vmatprep.subr.mxu0 %v115_v32 }
  0x2f   :  { %217 = vmatpush1.msra.mxu0 %v114_v33 }
  0x30   :  { %218 = vmatprep.subr.mxu0 %v113_v34  ;;  %v176_v34 = vld [vmem:[%s396_s4] sm:$0x3] }
  0x31   :  { %219 = vmatpush1.msra.mxu0 %v112_v35  ;;  %v181_v35 = vrot.slane %v176_v34, %v53_v6 }
  0x32   :  { %220 = vmatprep.subr.mxu0 %v175_v36  ;;  %v185_v36 = vrot.slane %v176_v34, %v78_v11 }
  0x33   :  { %221 = vmatpush2.msra.mxu0 %v174_v37 }
  0x34   :  { %222 = vmatprep.subr.mxu0 %v173_v38  ;;  %v261_v38 = vld [vmem:[%s397_s5] sm:$0x3] }
  0x35   :  { %223 = vmatpush2.msra.mxu0 %v172_v39 }
  0x36   :  { %224 = vmatprep.subr.mxu0 %v171_v40 }
  0x37   :  { %225 = vmatpush2.msra.mxu0 %v170_v41 }
  0x38   :  { %226 = vmatprep.subr.mxu0 %v169_v42 }
  0x39   :  { %227 = vmatpush2.msra.mxu0 %v168_v43  ;;  %v266_v43 = vrot.slane %v261_v38, %v53_v6 }
  0x3a   :  { %228 = vmatprep.subr.mxu0 %v167_v44  ;;  %v270_v44 = vrot.slane %v261_v38, %v78_v11 }
  0x3b   :  { %229 = vmatpush2.msra.mxu0 %v166_v45 }
  0x3c   :  { %230 = vmatprep.subr.mxu0 %v165_v46 }
  0x3d   :  { %231 = vmatpush2.msra.mxu0 %v164_v47 }
  0x3e   :  { %232 = vmatprep.subr.mxu0 %v163_v48 }
  0x3f   :  { %233 = vmatpush2.msra.mxu0 %v162_v49  ;;  %v293_v49 = vld [vmem:[#allocation2] ss:$0 sm:$0xff] }
  0x40   :  { %234 = vmatprep.subr.mxu0 %v161_v50 }
  0x41   :  { %235 = vmatpush2.msra.mxu0 %v160_v51 }
  0x42   :  { %236 = vmatprep.subr.mxu0 %v159_v52 }
  0x43   :  { %237 = vmatpush2.msra.mxu0 %v158_v53 }
  0x44   :  { %238 = vmatprep.subr.mxu0 %v157_v54 }
  0x45   :  { %239 = vmatpush2.msra.mxu0 %v156_v55 }
  0x46   :  { %240 = vmatprep.subr.mxu0 %v155_v56 }
  0x47   :  { %241 = vmatpush2.msra.mxu0 %v154_v57 }
  0x48   :  { %242 = vmatprep.subr.mxu0 %v153_v58 }
  0x49   :  { %243 = vmatpush2.msra.mxu0 %v152_v59 }
  0x4a   :  { %244 = vmatprep.subr.mxu0 %v151_v60 }
  0x4b   :  { %245 = vmatpush2.msra.mxu0 %v150_v61 }
  0x4c   :  { %246 = vmatprep.subr.mxu0 %v149_v62 }
  0x4d   :  { %247 = vmatpush2.msra.mxu0 %v148_v63 }
  0x4e   :  { %248 = vmatprep.subr.mxu0 %v147_v0 }
  0x4f   :  { %249 = vmatpush2.msra.mxu0 %v146_v1 }
  0x50   :  { %250 = vmatprep.subr.mxu0 %v145_v2 }
  0x51   :  { %251 = vmatpush2.msra.mxu0 %v144_v3 }
  0x8d   :  { %v48_v18 = vpop.permute.xlu0 %47 }
  0x8e   :  { %v69_v21 = vmul.f32 %v64_v14, %v48_v18  ;;  %v70_v22 = vmul.f32 %v68_v15, %v48_v18 }
  0x90   :  { %v82_v26 = vadd.f32 %v75_v19, %v69_v21  ;;  %v83_v29 = vadd.f32 %v79_v20, %v70_v22 }
  0x92   :  { %v86_v25 = vpop.permute.xlu0 %85 }
  0x93   :  { %v106_v27 = vmul.f32 %v101_v23, %v86_v25  ;;  %v107_v28 = vmul.f32 %v105_v24, %v86_v25 }
  0x95   :  { %v108_v30 = vadd.f32 %v106_v27, %v82_v26  ;;  %v109_v31 = vadd.f32 %v107_v28, %v83_v29 }
  0x97   :  { %v110_v32 = vmax.f32 %v108_v30, 0.0  ;;  %v111_v33 = vmax.f32 %v109_v31, 0.0 }
  0x99   :  { %252 = vmatprep.mubr.f32.mxu0 %v111_v33 }
  0x9a   :  { %253 = vmatmul.mubr.f32.vlgmr.msra.gmra.mxu0 %v110_v32 }
 0x15a   :  { %v254_v37 = vpop.f32.mrf.mxu0 }
 0x15b   :  { %v255_v39 = vadd.f32 %v254_v37, %v181_v35 }
 0x15c   :  { %v256_v40 = vpop.f32.mrf.mxu0 }
 0x15d   :  { %v259_v41 = vmax.f32 %v255_v39, 0.0  ;;  %v257_v42 = vadd.f32 %v256_v40, %v185_v36 }
 0x15f   :  { %v260_v45 = vmax.f32 %v257_v42, 0.0  ;;  %v273_v46 = vmul.f32 %v266_v43, %v259_v41 }
 0x161   :  { %v274_v47 = vmul.f32 %v270_v44, %v260_v45 }
 0x163   :  { %v275_v48 = vadd.f32 %v274_v47, %v273_v46 }
 0x165   :  { %276 = vadd.xlane.f32.xlu1 %v275_v48 }
 0x1ee   :  { %v277_v50 = vpop.xlane.xlu1 %276 }
 0x1ef   :  { %v285_v51 = vadd.f32 %v293_v49, %v277_v50 }
 0x1f1   :  { %287 = vst.msk [vmem:[%s399_s7] sm:$0xff] %vm286_vm0, %v285_v51 }
 0x1f2   :  { %292 = vsyncpa [#allocation4], 1 }

</bundles_post_ra>
